<compile_context>
chip_gen: v6e
topology: v6e:2x2x1
jax: 0.10.0
libtpu: 0.0.40
codegen_flags: <defaults>
</compile_context>

<pallas_src>
import functools
import math

import jax
import jax.numpy as jnp
from jax.experimental import pallas as pl
from jax.experimental.pallas import tpu as pltpu

LN_EPS = 1e-5  # PyTorch nn.LayerNorm default


def _round_up(x: int, m: int) -> int:
    return ((x + m - 1) // m) * m


def _head_kernel(x_ref, w1_ref, b1_ref, gamma_ref, beta_ref, w2_ref, b2_ref,
                 o_ref, *, hidden_true: int, approximate_gelu: bool):
    # ---- Linear 1: bf16 operands on the MXU, f32 accumulation ----
    h = jnp.dot(x_ref[...], w1_ref[...], preferred_element_type=jnp.float32)
    h = h + b1_ref[...]                      # b1 already f32

    # ---- LayerNorm (two-moment form, f32) over the true hidden width ----
    # Padded hidden lanes of h are exactly zero (w1/b1 zero-padded), so both
    # sums over the padded width equal sums over the true width; gamma/beta
    # zero-padding makes padded lanes of hn zero, so no lane mask is needed.
    inv_h = 1.0 / float(hidden_true)
    mean = jnp.sum(h, axis=-1, keepdims=True) * inv_h
    var = jnp.maximum(
        jnp.sum(h * h, axis=-1, keepdims=True) * inv_h - mean * mean, 0.0)
    hn = (h - mean) * jax.lax.rsqrt(var + LN_EPS)
    hn = hn * gamma_ref[...] + beta_ref[...]

    # ---- GELU ----
    if approximate_gelu:
        g = jax.nn.gelu(hn, approximate=True)        # tanh form -> EUP slot
    else:
        # exact erf: matches PyTorch nn.GELU default
        g = 0.5 * hn * (1.0 + jax.lax.erf(hn * (1.0 / math.sqrt(2.0))))

    # ---- Dropout: identity in eval mode ----
    # TODO(synk): training-mode dropout would need pltpu.prng_seed / prng_random_bits.

    # ---- Linear 2: cast activation to the (bf16) weight dtype for the MXU ----
    out = jnp.dot(g.astype(w2_ref.dtype), w2_ref[...],
                  preferred_element_type=jnp.float32)
    out = out + b2_ref[...]                  # b2 already f32
    o_ref[...] = out.astype(o_ref.dtype)


def prepare_params(params, *, param_dtype=jnp.bfloat16):
    """One-time (outside the hot path) lane-dense padding + dtype prep.

    Matmul weights are cast to `param_dtype` (bf16 MXU path, half the resident
    VMEM / weight DMA); biases and LayerNorm params stay f32.
    """
    w1, b1, gamma, beta, w2, b2 = (params["w1"], params["b1"], params["gamma"],
                                   params["beta"], params["w2"], params["b2"])
    D, H = w1.shape
    A = w2.shape[1]
    Dp, Hp, Ap = _round_up(D, 128), _round_up(H, 128), _round_up(A, 128)

    def pad2(a, rows, cols, dtype):
        a = a.astype(dtype)
        if a.shape == (rows, cols):          # skip jnp.pad when already aligned
            return a
        return jnp.pad(a, ((0, rows - a.shape[0]), (0, cols - a.shape[1])))

    prepared = {
        "w1": pad2(w1, Dp, Hp, param_dtype),
        "b1": pad2(b1, 1, Hp, jnp.float32),
        "gamma": pad2(gamma, 1, Hp, jnp.float32),
        "beta": pad2(beta, 1, Hp, jnp.float32),
        "w2": pad2(w2, Hp, Ap, param_dtype),
        "b2": pad2(b2, 1, Ap, jnp.float32),
    }
    return prepared, (D, H, A)


def answer_prediction_head(x, prepared, dims, *, block_b: int = 256,
                           approximate_gelu: bool = False):
    """x: (B, input_dim) -> logits (B, num_answers) in x.dtype."""
    D, H, A = dims
    w1, b1, gamma, beta, w2, b2 = (prepared["w1"], prepared["b1"],
                                   prepared["gamma"], prepared["beta"],
                                   prepared["w2"], prepared["b2"])
    B = x.shape[0]
    Dp, Hp = w1.shape
    Ap = w2.shape[1]
    compute_dtype = w1.dtype

    # Batch tile: sublane multiple; aim for >= 2 grid steps when B is large
    # enough (v7x megacore sharding + DMA/compute overlap) while keeping the
    # tile >= 128 rows (MXU-friendly M on v6e/v7x).
    TB = min(block_b, _round_up(B, 8))
    if TB >= 256 and _round_up(B, TB) // TB < 2:
        TB = _round_up(TB // 2, 128)
    Bp = _round_up(B, TB)

    xp = x.astype(compute_dtype)
    if xp.shape != (Bp, Dp):
        xp = jnp.pad(xp, ((0, Bp - B), (0, Dp - D)))

    grid = (Bp // TB,)

    # Explicit VMEM budget: x/out double buffers + single-buffered weights +
    # f32 LN/GELU temporaries.  2x margin, 8 MiB floor, 128 MiB cap.
    isz = lambda a: jnp.dtype(a.dtype).itemsize
    out_itemsize = jnp.dtype(x.dtype).itemsize
    vmem_need = (2 * TB * Dp * isz(xp)
                 + 2 * TB * Ap * out_itemsize
                 + w1.size * isz(w1) + w2.size * isz(w2)
                 + (b1.size + gamma.size + beta.size + b2.size) * 4
                 + 6 * TB * Hp * 4)
    vmem_limit = int(min(max(2 * vmem_need, 8 << 20), 128 << 20))

    flops = 2 * B * (D * H + H * A)
    bytes_accessed = int(
        xp.size * isz(xp)
        + sum(p.size * isz(p) for p in (w1, b1, gamma, beta, w2, b2))
        + Bp * Ap * out_itemsize)

    kernel = functools.partial(_head_kernel, hidden_true=H,
                               approximate_gelu=approximate_gelu)

    def _resident(shape, single_buffer):
        # Weights / biases / LN params: constant block index -> keep resident.
        if single_buffer:
            try:
                return pl.BlockSpec(shape, lambda i: (0, 0),
                                    pipeline_mode=pl.Buffered(1))
            except (TypeError, AttributeError):
                pass
        return pl.BlockSpec(shape, lambda i: (0, 0))

    def _call(single_buffer_weights):
        in_specs = [
            pl.BlockSpec((TB, Dp), lambda i: (i, 0)),      # x tile (pipelined)
            _resident((Dp, Hp), single_buffer_weights),     # w1
            _resident((1, Hp), single_buffer_weights),      # b1
            _resident((1, Hp), single_buffer_weights),      # gamma
            _resident((1, Hp), single_buffer_weights),      # beta
            _resident((Hp, Ap), single_buffer_weights),     # w2
            _resident((1, Ap), single_buffer_weights),      # b2
        ]
        return pl.pallas_call(
            kernel,
            out_shape=jax.ShapeDtypeStruct((Bp, Ap), x.dtype),
            grid=grid,
            in_specs=in_specs,
            out_specs=pl.BlockSpec((TB, Ap), lambda i: (i, 0)),
            compiler_params=pltpu.CompilerParams(
                dimension_semantics=("parallel",),
                vmem_limit_bytes=vmem_limit),
            cost_estimate=pl.CostEstimate(
                flops=flops, transcendentals=B * H,
                bytes_accessed=bytes_accessed),
        )(xp, w1, b1, gamma, beta, w2, b2)

    try:
        out = _call(single_buffer_weights=True)
    except Exception:
        # Fallback for JAX builds that reject Buffered(1); default
        # double-buffered resident specs are semantically identical.
        out = _call(single_buffer_weights=False)

    return out[:B, :A]


def init_params(key, input_dim, hidden_dim, num_answers, dtype=jnp.float32):
    """Deterministic synthetic parameters (shapes from the module __init__)."""
    k1, k2, k3, k4 = jax.random.split(key, 4)
    lim1 = 1.0 / math.sqrt(input_dim)
    lim2 = 1.0 / math.sqrt(hidden_dim)
    return {
        "w1": jax.random.uniform(k1, (input_dim, hidden_dim), dtype, -lim1, lim1),
        "b1": jax.random.uniform(k2, (1, hidden_dim), dtype, -lim1, lim1),
        "gamma": jnp.ones((1, hidden_dim), dtype),   # LayerNorm weight init
        "beta": jnp.zeros((1, hidden_dim), dtype),   # LayerNorm bias init
        "w2": jax.random.uniform(k3, (hidden_dim, num_answers), dtype, -lim2, lim2),
        "b2": jax.random.uniform(k4, (1, num_answers), dtype, -lim2, lim2),
    }


def _reference(x, p, *, compute_dtype=jnp.bfloat16):
    """Module forward with the same bf16-matmul / f32-accumulate precision as
    the kernel (f32 LayerNorm / exact-erf GELU)."""
    w1 = p["w1"].astype(compute_dtype)
    w2 = p["w2"].astype(compute_dtype)
    h = jnp.dot(x.astype(compute_dtype), w1,
                preferred_element_type=jnp.float32) + p["b1"].astype(jnp.float32)
    mean = jnp.mean(h, axis=-1, keepdims=True)
    var = jnp.mean((h - mean) ** 2, axis=-1, keepdims=True)
    hn = (h - mean) / jnp.sqrt(var + LN_EPS)
    hn = hn * p["gamma"].astype(jnp.float32) + p["beta"].astype(jnp.float32)
    g = 0.5 * hn * (1.0 + jax.lax.erf(hn / math.sqrt(2.0)))
    return jnp.dot(g.astype(compute_dtype), w2,
                   preferred_element_type=jnp.float32) + p["b2"].astype(jnp.float32)


if __name__ == "__main__":
    B, input_dim, hidden_dim, num_answers = 8, 32, 64, 16

    key = jax.random.PRNGKey(0)
    kx, kp = jax.random.split(key)
    x = jax.random.normal(kx, (B, input_dim), jnp.float32)
    params = init_params(kp, input_dim, hidden_dim, num_answers)

    prepared, dims = prepare_params(params)          # one-time pad + bf16 cast
    out = answer_prediction_head(x, prepared, dims)
    out = jax.block_until_ready(out)

    ref = _reference(x, params)
    assert out.shape == (B, num_answers), out.shape
    # Tolerance covers MXU-vs-XLA accumulation order and rsqrt/two-moment LN
    # rounding; both paths use bf16 matmuls with f32 accumulation.
    assert jnp.allclose(out, ref, atol=2e-3, rtol=2e-3), (
        float(jnp.max(jnp.abs(out - ref))))

    print("KERNEL_OK")
</pallas_src>

<mosaic_0001>
module attributes {stable_mosaic.version = 11 : i64} {
  func.func @_head_kernel(%arg0: i32, %arg1: memref<8x128xbf16, #tpu.memory_space<vmem>>, %arg2: memref<128x128xbf16, #tpu.memory_space<vmem>>, %arg3: memref<1x128xf32, #tpu.memory_space<vmem>>, %arg4: memref<1x128xf32, #tpu.memory_space<vmem>>, %arg5: memref<1x128xf32, #tpu.memory_space<vmem>>, %arg6: memref<128x128xbf16, #tpu.memory_space<vmem>>, %arg7: memref<1x128xf32, #tpu.memory_space<vmem>>, %arg8: memref<8x128xf32, #tpu.memory_space<vmem>>) attributes {dimension_semantics = [#tpu.dimension_semantics<parallel>], iteration_bounds = array<i64: 1>, scalar_prefetch = 0 : i64, scratch_operands = 0 : i64, tpu.core_type = #tpu.core_type<tc>, window_params = [{transform_indices = @transform_0, window_bounds = array<i64: 8, 128>}, {pipeline_mode = #tpu.pipeline_mode<synchronous>, transform_indices = @transform_1, window_bounds = array<i64: 128, 128>}, {pipeline_mode = #tpu.pipeline_mode<synchronous>, transform_indices = @transform_2, window_bounds = array<i64: 1, 128>}, {pipeline_mode = #tpu.pipeline_mode<synchronous>, transform_indices = @transform_3, window_bounds = array<i64: 1, 128>}, {pipeline_mode = #tpu.pipeline_mode<synchronous>, transform_indices = @transform_4, window_bounds = array<i64: 1, 128>}, {pipeline_mode = #tpu.pipeline_mode<synchronous>, transform_indices = @transform_5, window_bounds = array<i64: 128, 128>}, {pipeline_mode = #tpu.pipeline_mode<synchronous>, transform_indices = @transform_6, window_bounds = array<i64: 1, 128>}, {transform_indices = @transform_7, window_bounds = array<i64: 8, 128>}]} {
    %c0 = arith.constant 0 : index
    %c0_0 = arith.constant 0 : index
    %0 = vector.load %arg1[%c0, %c0_0] : memref<8x128xbf16, #tpu.memory_space<vmem>>, vector<8x128xbf16>
    %c0_1 = arith.constant 0 : index
    %c0_2 = arith.constant 0 : index
    %1 = vector.load %arg2[%c0_1, %c0_2] : memref<128x128xbf16, #tpu.memory_space<vmem>>, vector<128x128xbf16>
    %cst = arith.constant dense<0.000000e+00> : vector<8x128xf32>
    %2 = tpu.matmul %0, %1, %cst {dimension_numbers = #tpu.dot_dimension_numbers<[1], [0], [0], [1], [0, 0, 1, 1], [], []>} : vector<8x128xbf16>, vector<128x128xbf16>, vector<8x128xf32> -> vector<8x128xf32>
    %c0_3 = arith.constant 0 : index
    %c0_4 = arith.constant 0 : index
    %3 = vector.load %arg3[%c0_3, %c0_4] : memref<1x128xf32, #tpu.memory_space<vmem>>, vector<1x128xf32>
    %4 = vector.broadcast %3 : vector<1x128xf32> to vector<8x128xf32>
    %5 = arith.addf %2, %4 : vector<8x128xf32>
    %cst_5 = arith.constant dense<0.000000e+00> : vector<8xf32>
    %6 = vector.multi_reduction <add>, %5, %cst_5 [1] : vector<8x128xf32> to vector<8xf32>
    %7 = vector.shape_cast %6 : vector<8xf32> to vector<8x1xf32>
    %cst_6 = arith.constant 1.562500e-02 : f32
    %8 = vector.broadcast %cst_6 : f32 to vector<8x1xf32>
    %9 = arith.mulf %7, %8 : vector<8x1xf32>
    %10 = arith.mulf %5, %5 : vector<8x128xf32>
    %cst_7 = arith.constant dense<0.000000e+00> : vector<8xf32>
    %11 = vector.multi_reduction <add>, %10, %cst_7 [1] : vector<8x128xf32> to vector<8xf32>
    %12 = vector.shape_cast %11 : vector<8xf32> to vector<8x1xf32>
    %cst_8 = arith.constant 1.562500e-02 : f32
    %13 = vector.broadcast %cst_8 : f32 to vector<8x1xf32>
    %14 = arith.mulf %12, %13 : vector<8x1xf32>
    %15 = arith.mulf %9, %9 : vector<8x1xf32>
    %16 = arith.subf %14, %15 : vector<8x1xf32>
    %cst_9 = arith.constant 0.000000e+00 : f32
    %17 = vector.broadcast %cst_9 : f32 to vector<8x1xf32>
    %18 = arith.maximumf %16, %17 : vector<8x1xf32>
    %19 = vector.broadcast %9 : vector<8x1xf32> to vector<8x128xf32>
    %20 = arith.subf %5, %19 : vector<8x128xf32>
    %cst_10 = arith.constant 9.99999974E-6 : f32
    %21 = vector.broadcast %cst_10 : f32 to vector<8x1xf32>
    %22 = arith.addf %18, %21 : vector<8x1xf32>
    %23 = math.rsqrt %22 : vector<8x1xf32>
    %24 = vector.broadcast %23 : vector<8x1xf32> to vector<8x128xf32>
    %25 = arith.mulf %20, %24 : vector<8x128xf32>
    %c0_11 = arith.constant 0 : index
    %c0_12 = arith.constant 0 : index
    %26 = vector.load %arg4[%c0_11, %c0_12] : memref<1x128xf32, #tpu.memory_space<vmem>>, vector<1x128xf32>
    %27 = vector.broadcast %26 : vector<1x128xf32> to vector<8x128xf32>
    %28 = arith.mulf %25, %27 : vector<8x128xf32>
    %c0_13 = arith.constant 0 : index
    %c0_14 = arith.constant 0 : index
    %29 = vector.load %arg5[%c0_13, %c0_14] : memref<1x128xf32, #tpu.memory_space<vmem>>, vector<1x128xf32>
    %30 = vector.broadcast %29 : vector<1x128xf32> to vector<8x128xf32>
    %31 = arith.addf %28, %30 : vector<8x128xf32>
    %cst_15 = arith.constant 5.000000e-01 : f32
    %32 = vector.broadcast %cst_15 : f32 to vector<8x128xf32>
    %33 = arith.mulf %32, %31 : vector<8x128xf32>
    %cst_16 = arith.constant 0.707106769 : f32
    %34 = vector.broadcast %cst_16 : f32 to vector<8x128xf32>
    %35 = arith.mulf %31, %34 : vector<8x128xf32>
    %36 = math.erf %35 : vector<8x128xf32>
    %cst_17 = arith.constant 1.000000e+00 : f32
    %37 = vector.broadcast %cst_17 : f32 to vector<8x128xf32>
    %38 = arith.addf %37, %36 : vector<8x128xf32>
    %39 = arith.mulf %33, %38 : vector<8x128xf32>
    %40 = arith.truncf %39 : vector<8x128xf32> to vector<8x128xbf16>
    %c0_18 = arith.constant 0 : index
    %c0_19 = arith.constant 0 : index
    %41 = vector.load %arg6[%c0_18, %c0_19] : memref<128x128xbf16, #tpu.memory_space<vmem>>, vector<128x128xbf16>
    %cst_20 = arith.constant dense<0.000000e+00> : vector<8x128xf32>
    %42 = tpu.matmul %40, %41, %cst_20 {dimension_numbers = #tpu.dot_dimension_numbers<[1], [0], [0], [1], [0, 0, 1, 1], [], []>} : vector<8x128xbf16>, vector<128x128xbf16>, vector<8x128xf32> -> vector<8x128xf32>
    %c0_21 = arith.constant 0 : index
    %c0_22 = arith.constant 0 : index
    %43 = vector.load %arg7[%c0_21, %c0_22] : memref<1x128xf32, #tpu.memory_space<vmem>>, vector<1x128xf32>
    %44 = vector.broadcast %43 : vector<1x128xf32> to vector<8x128xf32>
    %45 = arith.addf %42, %44 : vector<8x128xf32>
    %c0_23 = arith.constant 0 : index
    %c0_24 = arith.constant 0 : index
    %46 = vector.load %arg8[%c0_23, %c0_24] : memref<8x128xf32, #tpu.memory_space<vmem>>, vector<8x128xf32>
    tpu.vector_store %arg8[%c0_23, %c0_24], %45 {strides = array<i32>} : memref<8x128xf32, #tpu.memory_space<vmem>>, vector<8x128xf32>,
    return
  }
  func.func @transform_0(%arg0: i32) -> (i32, i32) {
    %c0_i32 = arith.constant 0 : i32
    %c0_i32_0 = arith.constant 0 : i32
    return %arg0, %c0_i32 : i32, i32
  }
  func.func @transform_1(%arg0: i32) -> (i32, i32) {
    %c0_i32 = arith.constant 0 : i32
    %c0_i32_0 = arith.constant 0 : i32
    %c0_i32_1 = arith.constant 0 : i32
    return %c0_i32, %c0_i32_0 : i32, i32
  }
  func.func @transform_2(%arg0: i32) -> (i32, i32) {
    %c0_i32 = arith.constant 0 : i32
    %c0_i32_0 = arith.constant 0 : i32
    %c0_i32_1 = arith.constant 0 : i32
    return %c0_i32, %c0_i32_0 : i32, i32
  }
  func.func @transform_3(%arg0: i32) -> (i32, i32) {
    %c0_i32 = arith.constant 0 : i32
    %c0_i32_0 = arith.constant 0 : i32
    %c0_i32_1 = arith.constant 0 : i32
    return %c0_i32, %c0_i32_0 : i32, i32
  }
  func.func @transform_4(%arg0: i32) -> (i32, i32) {
    %c0_i32 = arith.constant 0 : i32
    %c0_i32_0 = arith.constant 0 : i32
    %c0_i32_1 = arith.constant 0 : i32
    return %c0_i32, %c0_i32_0 : i32, i32
  }
  func.func @transform_5(%arg0: i32) -> (i32, i32) {
    %c0_i32 = arith.constant 0 : i32
    %c0_i32_0 = arith.constant 0 : i32
    %c0_i32_1 = arith.constant 0 : i32
    return %c0_i32, %c0_i32_0 : i32, i32
  }
  func.func @transform_6(%arg0: i32) -> (i32, i32) {
    %c0_i32 = arith.constant 0 : i32
    %c0_i32_0 = arith.constant 0 : i32
    %c0_i32_1 = arith.constant 0 : i32
    return %c0_i32, %c0_i32_0 : i32, i32
  }
  func.func @transform_7(%arg0: i32) -> (i32, i32) {
    %c0_i32 = arith.constant 0 : i32
    %c0_i32_0 = arith.constant 0 : i32
    return %arg0, %c0_i32 : i32, i32
  }
}

module attributes {stable_mosaic.version = 11 : i64} {
  func.func @_head_kernel(%arg0: i32, %arg1: memref<8x128xbf16, #tpu.memory_space<vmem>>, %arg2: memref<128x128xbf16, #tpu.memory_space<vmem>>, %arg3: memref<1x128xf32, #tpu.memory_space<vmem>>, %arg4: memref<1x128xf32, #tpu.memory_space<vmem>>, %arg5: memref<1x128xf32, #tpu.memory_space<vmem>>, %arg6: memref<128x128xbf16, #tpu.memory_space<vmem>>, %arg7: memref<1x128xf32, #tpu.memory_space<vmem>>, %arg8: memref<8x128xf32, #tpu.memory_space<vmem>>) attributes {dimension_semantics = [#tpu.dimension_semantics<parallel>], iteration_bounds = array<i64: 1>, scalar_prefetch = 0 : i64, scratch_operands = 0 : i64, tpu.core_type = #tpu.core_type<tc>, window_params = [{transform_indices = @transform_0, window_bounds = array<i64: 8, 128>}, {pipeline_mode = #tpu.pipeline_mode<synchronous>, transform_indices = @transform_1, window_bounds = array<i64: 128, 128>}, {pipeline_mode = #tpu.pipeline_mode<synchronous>, transform_indices = @transform_2, window_bounds = array<i64: 1, 128>}, {pipeline_mode = #tpu.pipeline_mode<synchronous>, transform_indices = @transform_3, window_bounds = array<i64: 1, 128>}, {pipeline_mode = #tpu.pipeline_mode<synchronous>, transform_indices = @transform_4, window_bounds = array<i64: 1, 128>}, {pipeline_mode = #tpu.pipeline_mode<synchronous>, transform_indices = @transform_5, window_bounds = array<i64: 128, 128>}, {pipeline_mode = #tpu.pipeline_mode<synchronous>, transform_indices = @transform_6, window_bounds = array<i64: 1, 128>}, {transform_indices = @transform_7, window_bounds = array<i64: 8, 128>}]} {
    %c0 = arith.constant 0 : index
    %c0_0 = arith.constant 0 : index
    %0 = vector.load %arg1[%c0, %c0_0] : memref<8x128xbf16, #tpu.memory_space<vmem>>, vector<8x128xbf16>
    %c0_1 = arith.constant 0 : index
    %c0_2 = arith.constant 0 : index
    %1 = vector.load %arg2[%c0_1, %c0_2] : memref<128x128xbf16, #tpu.memory_space<vmem>>, vector<128x128xbf16>
    %cst = arith.constant dense<0.000000e+00> : vector<8x128xf32>
    %2 = tpu.matmul %0, %1, %cst {dimension_numbers = #tpu.dot_dimension_numbers<[1], [0], [0], [1], [0, 0, 1, 1], [], []>} : vector<8x128xbf16>, vector<128x128xbf16>, vector<8x128xf32> -> vector<8x128xf32>
    %c0_3 = arith.constant 0 : index
    %c0_4 = arith.constant 0 : index
    %3 = vector.load %arg3[%c0_3, %c0_4] : memref<1x128xf32, #tpu.memory_space<vmem>>, vector<1x128xf32>
    %4 = vector.broadcast %3 : vector<1x128xf32> to vector<8x128xf32>
    %5 = arith.addf %2, %4 : vector<8x128xf32>
    %cst_5 = arith.constant dense<0.000000e+00> : vector<8xf32>
    %6 = vector.multi_reduction <add>, %5, %cst_5 [1] : vector<8x128xf32> to vector<8xf32>
    %7 = vector.shape_cast %6 : vector<8xf32> to vector<8x1xf32>
    %cst_6 = arith.constant 1.562500e-02 : f32
    %8 = vector.broadcast %cst_6 : f32 to vector<8x1xf32>
    %9 = arith.mulf %7, %8 : vector<8x1xf32>
    %10 = arith.mulf %5, %5 : vector<8x128xf32>
    %cst_7 = arith.constant dense<0.000000e+00> : vector<8xf32>
    %11 = vector.multi_reduction <add>, %10, %cst_7 [1] : vector<8x128xf32> to vector<8xf32>
    %12 = vector.shape_cast %11 : vector<8xf32> to vector<8x1xf32>
    %cst_8 = arith.constant 1.562500e-02 : f32
    %13 = vector.broadcast %cst_8 : f32 to vector<8x1xf32>
    %14 = arith.mulf %12, %13 : vector<8x1xf32>
    %15 = arith.mulf %9, %9 : vector<8x1xf32>
    %16 = arith.subf %14, %15 : vector<8x1xf32>
    %cst_9 = arith.constant 0.000000e+00 : f32
    %17 = vector.broadcast %cst_9 : f32 to vector<8x1xf32>
    %18 = arith.maximumf %16, %17 : vector<8x1xf32>
    %19 = vector.broadcast %9 : vector<8x1xf32> to vector<8x128xf32>
    %20 = arith.subf %5, %19 : vector<8x128xf32>
    %cst_10 = arith.constant 9.99999974E-6 : f32
    %21 = vector.broadcast %cst_10 : f32 to vector<8x1xf32>
    %22 = arith.addf %18, %21 : vector<8x1xf32>
    %23 = math.rsqrt %22 : vector<8x1xf32>
    %24 = vector.broadcast %23 : vector<8x1xf32> to vector<8x128xf32>
    %25 = arith.mulf %20, %24 : vector<8x128xf32>
    %c0_11 = arith.constant 0 : index
    %c0_12 = arith.constant 0 : index
    %26 = vector.load %arg4[%c0_11, %c0_12] : memref<1x128xf32, #tpu.memory_space<vmem>>, vector<1x128xf32>
    %27 = vector.broadcast %26 : vector<1x128xf32> to vector<8x128xf32>
    %28 = arith.mulf %25, %27 : vector<8x128xf32>
    %c0_13 = arith.constant 0 : index
    %c0_14 = arith.constant 0 : index
    %29 = vector.load %arg5[%c0_13, %c0_14] : memref<1x128xf32, #tpu.memory_space<vmem>>, vector<1x128xf32>
    %30 = vector.broadcast %29 : vector<1x128xf32> to vector<8x128xf32>
    %31 = arith.addf %28, %30 : vector<8x128xf32>
    %cst_15 = arith.constant 5.000000e-01 : f32
    %32 = vector.broadcast %cst_15 : f32 to vector<8x128xf32>
    %33 = arith.mulf %32, %31 : vector<8x128xf32>
    %cst_16 = arith.constant 0.707106769 : f32
    %34 = vector.broadcast %cst_16 : f32 to vector<8x128xf32>
    %35 = arith.mulf %31, %34 : vector<8x128xf32>
    %36 = math.erf %35 : vector<8x128xf32>
    %cst_17 = arith.constant 1.000000e+00 : f32
    %37 = vector.broadcast %cst_17 : f32 to vector<8x128xf32>
    %38 = arith.addf %37, %36 : vector<8x128xf32>
    %39 = arith.mulf %33, %38 : vector<8x128xf32>
    %40 = arith.truncf %39 : vector<8x128xf32> to vector<8x128xbf16>
    %c0_18 = arith.constant 0 : index
    %c0_19 = arith.constant 0 : index
    %41 = vector.load %arg6[%c0_18, %c0_19] : memref<128x128xbf16, #tpu.memory_space<vmem>>, vector<128x128xbf16>
    %cst_20 = arith.constant dense<0.000000e+00> : vector<8x128xf32>
    %42 = tpu.matmul %40, %41, %cst_20 {dimension_numbers = #tpu.dot_dimension_numbers<[1], [0], [0], [1], [0, 0, 1, 1], [], []>} : vector<8x128xbf16>, vector<128x128xbf16>, vector<8x128xf32> -> vector<8x128xf32>
    %c0_21 = arith.constant 0 : index
    %c0_22 = arith.constant 0 : index
    %43 = vector.load %arg7[%c0_21, %c0_22] : memref<1x128xf32, #tpu.memory_space<vmem>>, vector<1x128xf32>
    %44 = vector.broadcast %43 : vector<1x128xf32> to vector<8x128xf32>
    %45 = arith.addf %42, %44 : vector<8x128xf32>
    %c0_23 = arith.constant 0 : index
    %c0_24 = arith.constant 0 : index
    %46 = vector.load %arg8[%c0_23, %c0_24] : memref<8x128xf32, #tpu.memory_space<vmem>>, vector<8x128xf32>
    tpu.vector_store %arg8[%c0_23, %c0_24], %45 {strides = array<i32>} : memref<8x128xf32, #tpu.memory_space<vmem>>, vector<8x128xf32>,
    return
  }
  func.func @transform_0(%arg0: i32) -> (i32, i32) {
    %c0_i32 = arith.constant 0 : i32
    %c0_i32_0 = arith.constant 0 : i32
    return %arg0, %c0_i32 : i32, i32
  }
  func.func @transform_1(%arg0: i32) -> (i32, i32) {
    %c0_i32 = arith.constant 0 : i32
    %c0_i32_0 = arith.constant 0 : i32
    %c0_i32_1 = arith.constant 0 : i32
    return %c0_i32, %c0_i32_0 : i32, i32
  }
  func.func @transform_2(%arg0: i32) -> (i32, i32) {
    %c0_i32 = arith.constant 0 : i32
    %c0_i32_0 = arith.constant 0 : i32
    %c0_i32_1 = arith.constant 0 : i32
    return %c0_i32, %c0_i32_0 : i32, i32
  }
  func.func @transform_3(%arg0: i32) -> (i32, i32) {
    %c0_i32 = arith.constant 0 : i32
    %c0_i32_0 = arith.constant 0 : i32
    %c0_i32_1 = arith.constant 0 : i32
    return %c0_i32, %c0_i32_0 : i32, i32
  }
  func.func @transform_4(%arg0: i32) -> (i32, i32) {
    %c0_i32 = arith.constant 0 : i32
    %c0_i32_0 = arith.constant 0 : i32
    %c0_i32_1 = arith.constant 0 : i32
    return %c0_i32, %c0_i32_0 : i32, i32
  }
  func.func @transform_5(%arg0: i32) -> (i32, i32) {
    %c0_i32 = arith.constant 0 : i32
    %c0_i32_0 = arith.constant 0 : i32
    %c0_i32_1 = arith.constant 0 : i32
    return %c0_i32, %c0_i32_0 : i32, i32
  }
  func.func @transform_6(%arg0: i32) -> (i32, i32) {
    %c0_i32 = arith.constant 0 : i32
    %c0_i32_0 = arith.constant 0 : i32
    %c0_i32_1 = arith.constant 0 : i32
    return %c0_i32, %c0_i32_0 : i32, i32
  }
  func.func @transform_7(%arg0: i32) -> (i32, i32) {
    %c0_i32 = arith.constant 0 : i32
    %c0_i32_0 = arith.constant 0 : i32
    return %arg0, %c0_i32 : i32, i32
  }
}

</mosaic_0001>

<bundles_post_ra>
// kernel: tpu_custom_call.1
= control target key start
LH: loop header
LB: loop body
LE: loop exit
PB: predicated region body
PF: predicated region fallthrough
CT: control target
= control target key end

     0   :  { %12 = vsyncpa [#allocation3], 0  ;;  %s607_s0 = inlined_call_operand.hbm [shape: bf16[8,128], index: 0, kind: input, shape index: {}]   ;;  %s608_s1 = inlined_call_operand.hbm [shape: bf16[128,128], index: 1, kind: input, shape index: {}]   ;;  %s609_s2 = inlined_call_operand.vmem [shape: f32[1,128], index: 2, kind: input, shape index: {}]   ;;  %s610_s3 = inlined_call_operand.vmem [shape: f32[1,128], index: 3, kind: input, shape index: {}]   ;;  %s611_s4 = inlined_call_operand.vmem [shape: f32[1,128], index: 4, kind: input, shape index: {}]   ;;  %s612_s5 = inlined_call_operand.hbm [shape: bf16[128,128], index: 5, kind: input, shape index: {}]   ;;  %s613_s6 = inlined_call_operand.vmem [shape: f32[1,128], index: 6, kind: input, shape index: {}]   ;;  %s614_s7 = inlined_call_operand.hbm [shape: f32[8,128], index: 7, kind: output, shape index: {}]  }
   0x1   :  { %13 = vsyncpa [#allocation6], 0 }
   0x2   :  { %14 = vsyncpa [#allocation4], 0  ;;  %s535_s24 = smov [#allocation5]  }
   0x3   :  { %s30_s25 = sshll.u32 %s535_s24, 4  ;;  %s31_s25 = int_to_ptr.vmem [resolvable:$true] %s30_s25 }
   0x4   :  { %s457_s26 = scalar_lea.vmem %s31_s25, 1024  ;;  %p462_p1 = scmp.lt.s32.totalorder %s31_s25, %s31_s25 }
   0x5   :  { %p458_p0 = scmp.ne.s32.totalorder %s31_s25, %s457_s26  ;;  %p463_p2 = scmp.lt.s32.totalorder %s457_s26, %s457_s26 }
   0x7   :  { %p464_p3 = por %p463_p2, %p462_p1 }
   0x9   :  { %p465_p4 = pnand %p464_p3, %p458_p0 }
   0xb   :  { %468 = shalt.err (!%p465_p4)
}
   0xc   :  { %s536_s27 = smov 64   ;;  %s537_s28 = smov 4  }
   0xd   :  { %36 = dma.hbm_to_vmem [thread:$0]  %s608_s1, 1024, %s31_s25, [#allocation6], %s536_s27, %s536_s27, %s537_s28  }
   0xe   :  { %s538_s8 = smov [#allocation2]   ;;  %s539_s10 = smov [#allocation7]  }
   0xf   :  { %s21_s9 = sshll.u32 %s538_s8, 4  ;;  %s48_s11 = sshll.u32 %s539_s10, 4  ;;  %s22_s9 = int_to_ptr.vmem [resolvable:$true] %s21_s9  ;;  %s49_s11 = int_to_ptr.vmem [resolvable:$true] %s48_s11 }
  0x10   :  { %s477_s12 = scalar_lea.vmem %s22_s9, 64  ;;  %p482_p6 = scmp.lt.s32.totalorder %s22_s9, %s22_s9 }
  0x11   :  { %p478_p5 = scmp.ne.s32.totalorder %s22_s9, %s477_s12  ;;  %p483_p7 = scmp.lt.s32.totalorder %s477_s12, %s477_s12 }
  0x13   :  { %p484_p8 = por %p483_p7, %p482_p6 }
  0x15   :  { %p485_p9 = pnand %p484_p8, %p478_p5 }
  0x17   :  { %488 = shalt.err (!%p485_p9)
}
  0x18   :  { %24 = dma.hbm_to_vmem [thread:$0]  %s607_s0, 64, %s22_s9, [#allocation3]  }
  0x19   :  { %s497_s15 = scalar_lea.vmem %s49_s11, 1024  ;;  %p502_p11 = scmp.lt.s32.totalorder %s49_s11, %s49_s11 }
  0x1a   :  { %p498_p10 = scmp.ne.s32.totalorder %s49_s11, %s497_s15  ;;  %p503_p12 = scmp.lt.s32.totalorder %s497_s15, %s497_s15 }
  0x1c   :  { %p504_p13 = por %p503_p12, %p502_p11 }
  0x1e   :  { %p505_p0 = pnand %p504_p13, %p498_p10 }
  0x20   :  { %508 = shalt.err (!%p505_p0)
}
  0x21   :  { %54 = dma.hbm_to_vmem [thread:$0]  %s612_s5, 1024, %s49_s11, [#allocation6], %s536_s27, %s536_s27, %s537_s28  }
  0x22   :  { %529 = dma.done.wait [#allocation3], 64  }
  0x23   :  { %530 = vsyncadd [#allocation3], 4294967232 }
  0x24   :  { %531 = dma.done.wait [#allocation6], 2048  }
  0x25   :  { %532 = vsyncadd [#allocation6], 4294965248  ;;  %v540_v0 = vmov 0.0   ;;  %vm541_vm0 = vmmov 0   ;;  %v429_v1 = vld [vmem:[#allocation5 + $0x38] sm:$0xff]   ;;  %v430_v2 = vld [vmem:[#allocation5 + $0x30] sm:$0xff]  }
  0x26   :  { %381 = vmatprep.subr.bf16.mxu0 %v540_v0  ;;  %397 = vmatprep.mubr.msk.bf16.mxu0 %vm541_vm0, %v540_v0  ;;  %v431_v3 = vld [vmem:[#allocation5 + $0x28] sm:$0xff]   ;;  %v432_v4 = vld [vmem:[#allocation5 + $0x20] sm:$0xff]   ;;  %v433_v5 = vld [vmem:[#allocation5 + $0x18] sm:$0xff]  }
  0x27   :  { %401 = vmatprep.subr.bf16.mxu1 %v540_v0  ;;  %417 = vmatprep.mubr.msk.bf16.mxu1 %vm541_vm0, %v540_v0  ;;  %v434_v6 = vld [vmem:[#allocation5 + $0x10] sm:$0xff]   ;;  %v435_v7 = vld [vmem:[#allocation5 + $0x8] sm:$0xff]   ;;  %v436_v8 = vld [vmem:[#allocation5] sm:$0xff]  }
  0x28   :  { %382 = vmatpush3.bf16.msra.mxu0 %v429_v1  ;;  %v67_v9 = vld [vmem:[#allocation2] sm:$0xf]  ;;  %v438_v18 = vld [vmem:[#allocation7 + $0x30] sm:$0xff]   ;;  %v439_v19 = vld [vmem:[#allocation7 + $0x28] sm:$0xff]  }
  0x29   :  { %383 = vmatprep.subr.bf16.mxu0 %v540_v0  ;;  %v343_v10 = vld [vmem:[%s609_s2] ss:$0 sm:$0xff]  ;;  %v440_v20 = vld [vmem:[#allocation7 + $0x20] sm:$0xff]   ;;  %v442_v22 = vld [vmem:[#allocation7 + $0x10] sm:$0xff]  }
  0x2a   :  { %v437_v17 = vld [vmem:[#allocation7 + $0x38] sm:$0xff]   ;;  %v443_v23 = vld [vmem:[#allocation7 + $0x8] sm:$0xff]   ;;  %v444_v24 = vld [vmem:[#allocation7] sm:$0xff]  }
  0x2b   :  { %402 = vmatpush3.bf16.msra.mxu1 %v437_v17  ;;  %v441_v21 = vld [vmem:[#allocation7 + $0x18] sm:$0xff]  }
  0x2c   :  { %384 = vmatpush3.bf16.msra.mxu0 %v430_v2  ;;  %403 = vmatprep.subr.bf16.mxu1 %v540_v0  ;;  %v352_v35 = vld [vmem:[%s610_s3] ss:$0 sm:$0xff]  ;;  %s542_s3 = smov [#allocation8]  }
  0x2d   :  { %385 = vmatprep.subr.bf16.mxu0 %v540_v0  ;;  %v353_v37 = vld [vmem:[%s611_s4] ss:$0 sm:$0xff]  ;;  %s333_s22 = sshll.u32 %s542_s3, 4  ;;  %s334_s22 = int_to_ptr.vmem [resolvable:$true] %s333_s22 }
  0x2e   :  { %v354_v46 = vld [vmem:[%s613_s6] ss:$0 sm:$0xff]  ;;  %s509_s4 = scalar_lea.vmem %s334_s22, 128  ;;  %p514_p2 = scmp.lt.s32.totalorder %s334_s22, %s334_s22 }
  0x2f   :  { %404 = vmatpush3.bf16.msra.mxu1 %v438_v18  ;;  %p510_p1 = scmp.ne.s32.totalorder %s334_s22, %s509_s4  ;;  %p515_p3 = scmp.lt.s32.totalorder %s509_s4, %s509_s4 }
  0x30   :  { %386 = vmatpush3.bf16.msra.mxu0 %v431_v3  ;;  %405 = vmatprep.subr.bf16.mxu1 %v540_v0 }
  0x31   :  { %387 = vmatprep.subr.bf16.mxu0 %v540_v0  ;;  %p516_p4 = por %p515_p3, %p514_p2 }
  0x33   :  { %406 = vmatpush3.bf16.msra.mxu1 %v439_v19  ;;  %p517_p5 = pnand %p516_p4, %p510_p1 }
  0x34   :  { %388 = vmatpush3.bf16.msra.mxu0 %v432_v4  ;;  %407 = vmatprep.subr.bf16.mxu1 %v540_v0 }
  0x35   :  { %389 = vmatprep.subr.bf16.mxu0 %v540_v0 }
  0x37   :  { %408 = vmatpush3.bf16.msra.mxu1 %v440_v20 }
  0x38   :  { %390 = vmatpush3.bf16.msra.mxu0 %v433_v5  ;;  %409 = vmatprep.subr.bf16.mxu1 %v540_v0 }
  0x39   :  { %391 = vmatprep.subr.bf16.mxu0 %v540_v0 }
  0x3b   :  { %410 = vmatpush3.bf16.msra.mxu1 %v441_v21 }
  0x3c   :  { %392 = vmatpush3.bf16.msra.mxu0 %v434_v6  ;;  %411 = vmatprep.subr.bf16.mxu1 %v540_v0 }
  0x3d   :  { %393 = vmatprep.subr.bf16.mxu0 %v540_v0 }
  0x3f   :  { %412 = vmatpush3.bf16.msra.mxu1 %v442_v22 }
  0x40   :  { %394 = vmatpush3.bf16.msra.mxu0 %v435_v7  ;;  %413 = vmatprep.subr.bf16.mxu1 %v540_v0 }
  0x41   :  { %395 = vmatprep.subr.bf16.mxu0 %v540_v0 }
  0x43   :  { %414 = vmatpush3.bf16.msra.mxu1 %v443_v23 }
  0x44   :  { %396 = vmatpush3.bf16.msra.mxu0 %v436_v8  ;;  %415 = vmatprep.subr.bf16.mxu1 %v540_v0 }
  0x47   :  { %398 = vmatmul.mubr.bf16.vlgmr.msra.gmra.mxu0 %v67_v9  ;;  %416 = vmatpush3.bf16.msra.mxu1 %v444_v24 }
 0x107   :  { %v173_v11 = vpop.f32.mrf.mxu0 }
 0x108   :  { %v174_v12 = vadd.f32 %v343_v10, %v173_v11 }
 0x109   :  { %v399_v13 = vpop.f32.mrf.mxu0 }
 0x10a   :  { %179 = vadd.xlane.f32.xlu0 %v174_v12  ;;  %v182_v15 = vmul.f32 %v174_v12, %v174_v12 }
 0x10b   :  { %v176_v14 = vpop.f32.mrf.mxu0 }
 0x10d   :  { %v400_v16 = vpop.f32.mrf.mxu0 }
 0x10e   :  { %183 = vadd.xlane.f32.xlu0 %v182_v15 }
 0x193   :  { %v180_v25 = vpop.xlane.xlu0 %179 }
 0x194   :  { %v181_v26 = vmul.f32 0.015625, %v180_v25 }
 0x196   :  { %v186_v28 = vmul.f32 %v181_v26, %v181_v26  ;;  %v189_v33 = vsub.f32 %v174_v12, %v181_v26 }
 0x197   :  { %v184_v27 = vpop.xlane.xlu0 %183 }
 0x198   :  { %v185_v29 = vmul.f32 0.015625, %v184_v27 }
 0x19a   :  { %v187_v30 = vsub.f32 %v185_v29, %v186_v28 }
 0x19c   :  { %v188_v31 = vmax.f32 %v187_v30, 0.0 }
 0x19e   :  { %v190_v32 = vadd.f32 1e-05, %v188_v31 }
 0x1a0   :  { %445 = vrsqrt.f32 %v190_v32 }
 0x1ad   :  { %v446_v34 = vpop.eup %445 }
 0x1ae   :  { %v192_v36 = vmul.f32 %v446_v34, %v189_v33 }
 0x1b0   :  { %v200_v38 = vmul.f32 %v352_v35, %v192_v36 }
 0x1b2   :  { %v208_v39 = vadd.f32 %v353_v37, %v200_v38 }
 0x1b4   :  { %v210_v40 = vmul.f32 0.70710677, %v208_v39  ;;  %v209_v42 = vmul.f32 0.5, %v208_v39 }
 0x1b6   :  { %447 = verf.f32 %v210_v40 }
 0x1c3   :  { %v448_v41 = vpop.eup %447 }
 0x1c4   :  { %v212_v43 = vadd.f32 1.0, %v448_v41 }
 0x1c6   :  { %v213_v44 = vmul.f32 %v212_v43, %v209_v42 }
 0x1c8   :  { %v214_v45 = vpack.c.bf16 %v213_v44, %v213_v44 }
 0x1ca   :  { %418 = vmatmul.mubr.bf16.vlgmr.msra.gmra.mxu1 %v214_v45 }
 0x28a   :  { %v320_v47 = vpop.f32.mrf.mxu1 }
 0x28b   :  { %v321_v48 = vadd.f32 %v354_v46, %v320_v47 }
 0x28c   :  { %v419_v49 = vpop.f32.mrf.mxu1 }
 0x28d   :  { %326 = vst [vmem:[#allocation8] sm:$0xff] %v321_v48 }
 0x28e   :  { %v323_v50 = vpop.f32.mrf.mxu1 }
 0x28f   :  { %520 = shalt.err (!%p517_p5)
}
 0x290   :  { %336 = dma.vmem_to_hbm [thread:$0]  %s334_s22, 128, %s614_s7, [#allocation4]   ;;  %v420_v51 = vpop.f32.mrf.mxu1 }
 0x291   :  { %533 = dma.done.wait [#allocation4], 128  }
 0x292   :  { %534 = vsyncadd [#allocation4], 4294967168 }
 0x293   :  { %340 = vsyncpa [#allocation3], 1 }
 0x294   :  { %341 = vsyncpa [#allocation6], 1 }
 0x295   :  { %342 = vsyncpa [#allocation4], 1 }

// kernel: tpu_custom_call.1
= control target key start
LH: loop header
LB: loop body
LE: loop exit
PB: predicated region body
PF: predicated region fallthrough
CT: control target
= control target key end

     0   :  { %12 = vsyncpa [#allocation3], 0  ;;  %s607_s0 = inlined_call_operand.hbm [shape: bf16[8,128], index: 0, kind: input, shape index: {}]   ;;  %s608_s1 = inlined_call_operand.hbm [shape: bf16[128,128], index: 1, kind: input, shape index: {}]   ;;  %s609_s2 = inlined_call_operand.vmem [shape: f32[1,128], index: 2, kind: input, shape index: {}]   ;;  %s610_s3 = inlined_call_operand.vmem [shape: f32[1,128], index: 3, kind: input, shape index: {}]   ;;  %s611_s4 = inlined_call_operand.vmem [shape: f32[1,128], index: 4, kind: input, shape index: {}]   ;;  %s612_s5 = inlined_call_operand.hbm [shape: bf16[128,128], index: 5, kind: input, shape index: {}]   ;;  %s613_s6 = inlined_call_operand.vmem [shape: f32[1,128], index: 6, kind: input, shape index: {}]   ;;  %s614_s7 = inlined_call_operand.hbm [shape: f32[8,128], index: 7, kind: output, shape index: {}]  }
   0x1   :  { %13 = vsyncpa [#allocation6], 0 }
   0x2   :  { %14 = vsyncpa [#allocation4], 0  ;;  %s535_s24 = smov [#allocation5]  }
   0x3   :  { %s30_s25 = sshll.u32 %s535_s24, 4  ;;  %s31_s25 = int_to_ptr.vmem [resolvable:$true] %s30_s25 }
   0x4   :  { %s457_s26 = scalar_lea.vmem %s31_s25, 1024  ;;  %p462_p1 = scmp.lt.s32.totalorder %s31_s25, %s31_s25 }
   0x5   :  { %p458_p0 = scmp.ne.s32.totalorder %s31_s25, %s457_s26  ;;  %p463_p2 = scmp.lt.s32.totalorder %s457_s26, %s457_s26 }
   0x7   :  { %p464_p3 = por %p463_p2, %p462_p1 }
   0x9   :  { %p465_p4 = pnand %p464_p3, %p458_p0 }
   0xb   :  { %468 = shalt.err (!%p465_p4)
}
   0xc   :  { %s536_s27 = smov 64   ;;  %s537_s28 = smov 4  }
   0xd   :  { %36 = dma.hbm_to_vmem [thread:$0]  %s608_s1, 1024, %s31_s25, [#allocation6], %s536_s27, %s536_s27, %s537_s28  }
   0xe   :  { %s538_s8 = smov [#allocation2]   ;;  %s539_s10 = smov [#allocation7]  }
   0xf   :  { %s21_s9 = sshll.u32 %s538_s8, 4  ;;  %s48_s11 = sshll.u32 %s539_s10, 4  ;;  %s22_s9 = int_to_ptr.vmem [resolvable:$true] %s21_s9  ;;  %s49_s11 = int_to_ptr.vmem [resolvable:$true] %s48_s11 }
  0x10   :  { %s477_s12 = scalar_lea.vmem %s22_s9, 64  ;;  %p482_p6 = scmp.lt.s32.totalorder %s22_s9, %s22_s9 }
  0x11   :  { %p478_p5 = scmp.ne.s32.totalorder %s22_s9, %s477_s12  ;;  %p483_p7 = scmp.lt.s32.totalorder %s477_s12, %s477_s12 }
  0x13   :  { %p484_p8 = por %p483_p7, %p482_p6 }
  0x15   :  { %p485_p9 = pnand %p484_p8, %p478_p5 }
  0x17   :  { %488 = shalt.err (!%p485_p9)
}
  0x18   :  { %24 = dma.hbm_to_vmem [thread:$0]  %s607_s0, 64, %s22_s9, [#allocation3]  }
  0x19   :  { %s497_s15 = scalar_lea.vmem %s49_s11, 1024  ;;  %p502_p11 = scmp.lt.s32.totalorder %s49_s11, %s49_s11 }
  0x1a   :  { %p498_p10 = scmp.ne.s32.totalorder %s49_s11, %s497_s15  ;;  %p503_p12 = scmp.lt.s32.totalorder %s497_s15, %s497_s15 }
  0x1c   :  { %p504_p13 = por %p503_p12, %p502_p11 }
  0x1e   :  { %p505_p0 = pnand %p504_p13, %p498_p10 }
  0x20   :  { %508 = shalt.err (!%p505_p0)
}
  0x21   :  { %54 = dma.hbm_to_vmem [thread:$0]  %s612_s5, 1024, %s49_s11, [#allocation6], %s536_s27, %s536_s27, %s537_s28  }
  0x22   :  { %529 = dma.done.wait [#allocation3], 64  }
  0x23   :  { %530 = vsyncadd [#allocation3], 4294967232 }
  0x24   :  { %531 = dma.done.wait [#allocation6], 2048  }
  0x25   :  { %532 = vsyncadd [#allocation6], 4294965248  ;;  %v540_v0 = vmov 0.0   ;;  %vm541_vm0 = vmmov 0   ;;  %v429_v1 = vld [vmem:[#allocation5 + $0x38] sm:$0xff]   ;;  %v430_v2 = vld [vmem:[#allocation5 + $0x30] sm:$0xff]  }
  0x26   :  { %381 = vmatprep.subr.bf16.mxu0 %v540_v0  ;;  %397 = vmatprep.mubr.msk.bf16.mxu0 %vm541_vm0, %v540_v0  ;;  %v431_v3 = vld [vmem:[#allocation5 + $0x28] sm:$0xff]   ;;  %v432_v4 = vld [vmem:[#allocation5 + $0x20] sm:$0xff]   ;;  %v433_v5 = vld [vmem:[#allocation5 + $0x18] sm:$0xff]  }
  0x27   :  { %401 = vmatprep.subr.bf16.mxu1 %v540_v0  ;;  %417 = vmatprep.mubr.msk.bf16.mxu1 %vm541_vm0, %v540_v0  ;;  %v434_v6 = vld [vmem:[#allocation5 + $0x10] sm:$0xff]   ;;  %v435_v7 = vld [vmem:[#allocation5 + $0x8] sm:$0xff]   ;;  %v436_v8 = vld [vmem:[#allocation5] sm:$0xff]  }
  0x28   :  { %382 = vmatpush3.bf16.msra.mxu0 %v429_v1  ;;  %v67_v9 = vld [vmem:[#allocation2] sm:$0xf]  ;;  %v438_v18 = vld [vmem:[#allocation7 + $0x30] sm:$0xff]   ;;  %v439_v19 = vld [vmem:[#allocation7 + $0x28] sm:$0xff]  }
  0x29   :  { %383 = vmatprep.subr.bf16.mxu0 %v540_v0  ;;  %v343_v10 = vld [vmem:[%s609_s2] ss:$0 sm:$0xff]  ;;  %v440_v20 = vld [vmem:[#allocation7 + $0x20] sm:$0xff]   ;;  %v442_v22 = vld [vmem:[#allocation7 + $0x10] sm:$0xff]  }
  0x2a   :  { %v437_v17 = vld [vmem:[#allocation7 + $0x38] sm:$0xff]   ;;  %v443_v23 = vld [vmem:[#allocation7 + $0x8] sm:$0xff]   ;;  %v444_v24 = vld [vmem:[#allocation7] sm:$0xff]  }
  0x2b   :  { %402 = vmatpush3.bf16.msra.mxu1 %v437_v17  ;;  %v441_v21 = vld [vmem:[#allocation7 + $0x18] sm:$0xff]  }
  0x2c   :  { %384 = vmatpush3.bf16.msra.mxu0 %v430_v2  ;;  %403 = vmatprep.subr.bf16.mxu1 %v540_v0  ;;  %v352_v35 = vld [vmem:[%s610_s3] ss:$0 sm:$0xff]  ;;  %s542_s3 = smov [#allocation8]  }
  0x2d   :  { %385 = vmatprep.subr.bf16.mxu0 %v540_v0  ;;  %v353_v37 = vld [vmem:[%s611_s4] ss:$0 sm:$0xff]  ;;  %s333_s22 = sshll.u32 %s542_s3, 4  ;;  %s334_s22 = int_to_ptr.vmem [resolvable:$true] %s333_s22 }
  0x2e   :  { %v354_v46 = vld [vmem:[%s613_s6] ss:$0 sm:$0xff]  ;;  %s509_s4 = scalar_lea.vmem %s334_s22, 128  ;;  %p514_p2 = scmp.lt.s32.totalorder %s334_s22, %s334_s22 }
  0x2f   :  { %404 = vmatpush3.bf16.msra.mxu1 %v438_v18  ;;  %p510_p1 = scmp.ne.s32.totalorder %s334_s22, %s509_s4  ;;  %p515_p3 = scmp.lt.s32.totalorder %s509_s4, %s509_s4 }
  0x30   :  { %386 = vmatpush3.bf16.msra.mxu0 %v431_v3  ;;  %405 = vmatprep.subr.bf16.mxu1 %v540_v0 }
  0x31   :  { %387 = vmatprep.subr.bf16.mxu0 %v540_v0  ;;  %p516_p4 = por %p515_p3, %p514_p2 }
  0x33   :  { %406 = vmatpush3.bf16.msra.mxu1 %v439_v19  ;;  %p517_p5 = pnand %p516_p4, %p510_p1 }
  0x34   :  { %388 = vmatpush3.bf16.msra.mxu0 %v432_v4  ;;  %407 = vmatprep.subr.bf16.mxu1 %v540_v0 }
  0x35   :  { %389 = vmatprep.subr.bf16.mxu0 %v540_v0 }
  0x37   :  { %408 = vmatpush3.bf16.msra.mxu1 %v440_v20 }
  0x38   :  { %390 = vmatpush3.bf16.msra.mxu0 %v433_v5  ;;  %409 = vmatprep.subr.bf16.mxu1 %v540_v0 }
  0x39   :  { %391 = vmatprep.subr.bf16.mxu0 %v540_v0 }
  0x3b   :  { %410 = vmatpush3.bf16.msra.mxu1 %v441_v21 }
  0x3c   :  { %392 = vmatpush3.bf16.msra.mxu0 %v434_v6  ;;  %411 = vmatprep.subr.bf16.mxu1 %v540_v0 }
  0x3d   :  { %393 = vmatprep.subr.bf16.mxu0 %v540_v0 }
  0x3f   :  { %412 = vmatpush3.bf16.msra.mxu1 %v442_v22 }
  0x40   :  { %394 = vmatpush3.bf16.msra.mxu0 %v435_v7  ;;  %413 = vmatprep.subr.bf16.mxu1 %v540_v0 }
  0x41   :  { %395 = vmatprep.subr.bf16.mxu0 %v540_v0 }
  0x43   :  { %414 = vmatpush3.bf16.msra.mxu1 %v443_v23 }
  0x44   :  { %396 = vmatpush3.bf16.msra.mxu0 %v436_v8  ;;  %415 = vmatprep.subr.bf16.mxu1 %v540_v0 }
  0x47   :  { %398 = vmatmul.mubr.bf16.vlgmr.msra.gmra.mxu0 %v67_v9  ;;  %416 = vmatpush3.bf16.msra.mxu1 %v444_v24 }
 0x107   :  { %v173_v11 = vpop.f32.mrf.mxu0 }
 0x108   :  { %v174_v12 = vadd.f32 %v343_v10, %v173_v11 }
 0x109   :  { %v399_v13 = vpop.f32.mrf.mxu0 }
 0x10a   :  { %179 = vadd.xlane.f32.xlu0 %v174_v12  ;;  %v182_v15 = vmul.f32 %v174_v12, %v174_v12 }
 0x10b   :  { %v176_v14 = vpop.f32.mrf.mxu0 }
 0x10d   :  { %v400_v16 = vpop.f32.mrf.mxu0 }
 0x10e   :  { %183 = vadd.xlane.f32.xlu0 %v182_v15 }
 0x193   :  { %v180_v25 = vpop.xlane.xlu0 %179 }
 0x194   :  { %v181_v26 = vmul.f32 0.015625, %v180_v25 }
 0x196   :  { %v186_v28 = vmul.f32 %v181_v26, %v181_v26  ;;  %v189_v33 = vsub.f32 %v174_v12, %v181_v26 }
 0x197   :  { %v184_v27 = vpop.xlane.xlu0 %183 }
 0x198   :  { %v185_v29 = vmul.f32 0.015625, %v184_v27 }
 0x19a   :  { %v187_v30 = vsub.f32 %v185_v29, %v186_v28 }
 0x19c   :  { %v188_v31 = vmax.f32 %v187_v30, 0.0 }
 0x19e   :  { %v190_v32 = vadd.f32 1e-05, %v188_v31 }
 0x1a0   :  { %445 = vrsqrt.f32 %v190_v32 }
 0x1ad   :  { %v446_v34 = vpop.eup %445 }
 0x1ae   :  { %v192_v36 = vmul.f32 %v446_v34, %v189_v33 }
 0x1b0   :  { %v200_v38 = vmul.f32 %v352_v35, %v192_v36 }
 0x1b2   :  { %v208_v39 = vadd.f32 %v353_v37, %v200_v38 }
 0x1b4   :  { %v210_v40 = vmul.f32 0.70710677, %v208_v39  ;;  %v209_v42 = vmul.f32 0.5, %v208_v39 }
 0x1b6   :  { %447 = verf.f32 %v210_v40 }
 0x1c3   :  { %v448_v41 = vpop.eup %447 }
 0x1c4   :  { %v212_v43 = vadd.f32 1.0, %v448_v41 }
 0x1c6   :  { %v213_v44 = vmul.f32 %v212_v43, %v209_v42 }
 0x1c8   :  { %v214_v45 = vpack.c.bf16 %v213_v44, %v213_v44 }
 0x1ca   :  { %418 = vmatmul.mubr.bf16.vlgmr.msra.gmra.mxu1 %v214_v45 }
 0x28a   :  { %v320_v47 = vpop.f32.mrf.mxu1 }
 0x28b   :  { %v321_v48 = vadd.f32 %v354_v46, %v320_v47 }
 0x28c   :  { %v419_v49 = vpop.f32.mrf.mxu1 }
 0x28d   :  { %326 = vst [vmem:[#allocation8] sm:$0xff] %v321_v48 }
 0x28e   :  { %v323_v50 = vpop.f32.mrf.mxu1 }
 0x28f   :  { %520 = shalt.err (!%p517_p5)
}
 0x290   :  { %336 = dma.vmem_to_hbm [thread:$0]  %s334_s22, 128, %s614_s7, [#allocation4]   ;;  %v420_v51 = vpop.f32.mrf.mxu1 }
 0x291   :  { %533 = dma.done.wait [#allocation4], 128  }
 0x292   :  { %534 = vsyncadd [#allocation4], 4294967168 }
 0x293   :  { %340 = vsyncpa [#allocation3], 1 }
 0x294   :  { %341 = vsyncpa [#allocation6], 1 }
 0x295   :  { %342 = vsyncpa [#allocation4], 1 }

</bundles_post_ra>
